<compile_context>
chip_gen: v6e
topology: v6e:2x2x1
jax: 0.10.0
libtpu: 0.0.40
codegen_flags: <defaults>
</compile_context>

<pallas_src>
from abc import ABC

import jax
import jax.numpy as jnp
from jax import lax
from jax.experimental import pallas as pl
from jax.experimental.pallas import tpu as pltpu


# ---------------------------------------------------------------------------
# Helpers.
# ---------------------------------------------------------------------------
def _round_up(x, m):
    return ((x + m - 1) // m) * m


def _cdiv(a, b):
    return -(-a // b)


def _vmem_capacity_bytes():
    try:
        return int(pltpu.get_tpu_info().vmem_capacity_bytes)
    except Exception:
        # Generation-aware fallback: 128 MiB on v5e/v6e, 64 MiB on v7x/unknown.
        try:
            kind = jax.devices()[0].device_kind.lower()
        except Exception:
            kind = ""
        if "v5" in kind or "v6" in kind:
            return 128 * 1024 * 1024
        return 64 * 1024 * 1024


def _pick_bm(B, prefer_tiles=2):
    """Largest 8-aligned divisor row tile, preferring >= prefer_tiles tiles
    so the 'parallel' grid axis can be sharded across v7x's two TensorCores."""
    for min_tiles in (prefer_tiles, 1):
        for bm in (512, 256, 128, 64, 32, 16, 8):
            if B % bm == 0 and B // bm >= min_tiles:
                return bm
    return B  # small / odd batch: single full-row tile (full dim is legal)


def _shrink_bm_for_resident(bm, B, cols_f32, cap):
    """Halve bm (keeping divisibility) while the resident f32 block is big."""
    while bm >= 16 and B % (bm // 2) == 0 and bm * cols_f32 * 4 > cap // 4:
        bm //= 2
    return bm


def _pick_bk(rows_per_step, itemsize, V, resident_bytes, max_bk=16384):
    """Largest 128-multiple reduction tile fitting the VMEM budget, then
    rebalanced so all k tiles are (nearly) even."""
    cap = _vmem_capacity_bytes()
    budget = int(cap * 0.35)               # inputs (double buffered) + slack
    per_col = 2 * rows_per_step * itemsize  # 2 pipeline buffers per input row
    avail = budget - resident_bytes
    bk = avail // per_col if avail > 0 else 128
    bk = max(128, min(int(max_bk), (int(bk) // 128) * 128))
    v_pad = _round_up(V, 128)
    if v_pad <= bk:
        return v_pad                        # whole reduction in one step
    nk = _cdiv(V, bk)
    return int(_round_up(_cdiv(V, nk), 128))  # even tiles, no degenerate tail


def _compiler_params(dimension_semantics):
    cap = _vmem_capacity_bytes()
    return pltpu.CompilerParams(
        dimension_semantics=dimension_semantics,
        vmem_limit_bytes=int(cap * 0.7),
    )


def _lane_mask(width, col_start, V):
    """Static (1, width) mask: global column (col_start + lane) < V."""
    lane = lax.broadcasted_iota(jnp.int32, (1, width), dimension=1)
    return (col_start + lane) < V


# ---------------------------------------------------------------------------
# Kernel 1: cross dot product  scores[i, j] = sum_v q[i, v] * d[j, v]
# ---------------------------------------------------------------------------
def cross_dot_product(q, d, *, max_bk=16384):
    Bq, V = q.shape
    Bd, Vd = d.shape
    assert V == Vd, "q and d must share the vocab/latent dimension"

    cap = _vmem_capacity_bytes()
    bm = _pick_bm(Bq)
    bm = _shrink_bm_for_resident(bm, Bq, Bd, cap)
    itemsize = max(q.dtype.itemsize, d.dtype.itemsize)
    resident = bm * Bd * 4                     # resident f32 output block
    bk = _pick_bk(bm + Bd, itemsize, V, resident, max_bk)
    nk = _cdiv(V, bk)
    rem = V % bk
    last = nk - 1

    # TODO(synk): when Bd*V*itemsize fits ~1/3 VMEM, keep d fully resident to
    # avoid re-streaming it (Bq/bm)x; with large even bk this factor is small.

    def kernel(q_ref, d_ref, o_ref):
        k = pl.program_id(1)

        @pl.when(k == 0)
        def _():
            o_ref[...] = jnp.zeros_like(o_ref)

        def accumulate(masked):
            qb = q_ref[...]
            db = d_ref[...]
            if masked:
                # last*bk is static, so this mask is a compile-time constant.
                valid = _lane_mask(bk, last * bk, V)
                qb = jnp.where(valid, qb, 0)
                db = jnp.where(valid, db, 0)
            # Contract the lane (V) dims on the MXU (same pattern as the
            # q @ k^T einsum in flash attention) -- no per-step d transpose.
            o_ref[...] += lax.dot_general(
                qb, db,
                dimension_numbers=(((1,), (1,)), ((), ())),
                preferred_element_type=jnp.float32,
            )

        if rem:
            @pl.when(k == last)
            def _():
                accumulate(True)

            if nk > 1:
                @pl.when(k < last)
                def _():
                    accumulate(False)
        else:
            accumulate(False)

    return pl.pallas_call(
        kernel,
        out_shape=jax.ShapeDtypeStruct((Bq, Bd), jnp.float32),
        grid_spec=pltpu.PrefetchScalarGridSpec(
            num_scalar_prefetch=0,
            grid=(Bq // bm, nk),
            in_specs=[
                pl.BlockSpec((bm, bk), lambda i, k: (i, k)),
                pl.BlockSpec((Bd, bk), lambda i, k: (0, k)),
            ],
            out_specs=pl.BlockSpec((bm, Bd), lambda i, k: (i, 0)),
        ),
        compiler_params=_compiler_params(("parallel", "arbitrary")),
    )(q, d)


# ---------------------------------------------------------------------------
# Shared elementwise accumulation: per-128-lane-chunk products into up to 4
# independent f32 accumulators (no full-tile f32 prod, short add chains).
# ---------------------------------------------------------------------------
def _chunked_pair_accumulate(acc_ref, qb, db, *, bk, rows, masked, last_col0, V):
    nchunks = bk // 128
    naccs = min(4, nchunks)
    accs = [jnp.zeros((rows, 128), jnp.float32) for _ in range(naccs)]
    used = [False] * naccs
    for c in range(nchunks):
        col0 = last_col0 + c * 128  # static when masked (last step only)
        if masked and col0 >= V:
            continue  # chunk entirely out of bounds: statically skipped
        sl = slice(c * 128, (c + 1) * 128)
        pc = (qb[:, sl] * db[:, sl]).astype(jnp.float32)
        if masked and col0 + 128 > V:
            pc = jnp.where(_lane_mask(128, col0, V), pc, 0.0)
        a = c % naccs
        accs[a] = accs[a] + pc
        used[a] = True
    total = None
    for a in range(naccs):
        if used[a]:
            total = accs[a] if total is None else total + accs[a]
    if total is not None:
        acc_ref[...] += total


# ---------------------------------------------------------------------------
# Kernel 2: paired dot product  scores[i] = sum_v q[i, v] * d[i, v]
# ---------------------------------------------------------------------------
def paired_dot_product(q, d, *, max_bk=16384):
    B, V = q.shape
    assert d.shape == (B, V), "paired scoring requires matched q/d shapes"

    bm = _pick_bm(B)
    itemsize = max(q.dtype.itemsize, d.dtype.itemsize)
    resident = bm * 128 * 4 + bm * 4          # lane-dense accumulator + out
    bk = _pick_bk(2 * bm, itemsize, V, resident, max_bk)
    nk = _cdiv(V, bk)
    rem = V % bk
    last = nk - 1

    def kernel(q_ref, d_ref, o_ref, acc_ref):
        k = pl.program_id(1)

        @pl.when(k == 0)
        def _():
            acc_ref[...] = jnp.zeros_like(acc_ref)

        def accumulate(masked):
            _chunked_pair_accumulate(
                acc_ref, q_ref[...], d_ref[...],
                bk=bk, rows=bm, masked=masked, last_col0=last * bk, V=V)

        if rem:
            @pl.when(k == last)
            def _():
                accumulate(True)

            if nk > 1:
                @pl.when(k < last)
                def _():
                    accumulate(False)
        else:
            accumulate(False)

        @pl.when(k == last)
        def _():
            # Single cross-lane (XLU) reduce, once per row tile.
            o_ref[...] = jnp.sum(acc_ref[...], axis=-1, keepdims=True)

    out = pl.pallas_call(
        kernel,
        out_shape=jax.ShapeDtypeStruct((B, 1), jnp.float32),
        grid_spec=pltpu.PrefetchScalarGridSpec(
            num_scalar_prefetch=0,
            grid=(B // bm, nk),
            in_specs=[
                pl.BlockSpec((bm, bk), lambda i, k: (i, k)),
                pl.BlockSpec((bm, bk), lambda i, k: (i, k)),
            ],
            out_specs=pl.BlockSpec((bm, 1), lambda i, k: (i, 0)),
            scratch_shapes=[pltpu.VMEM((bm, 128), jnp.float32)],
        ),
        compiler_params=_compiler_params(("parallel", "arbitrary")),
    )(q, d)
    return out[:, 0]


# ---------------------------------------------------------------------------
# Kernel 3: fused cross + paired scores in a single pass over q
# (row-tiled so the resident cross block is (bm, B), not (B, B)).
# ---------------------------------------------------------------------------
def cross_and_paired_dot_product(q, d, *, max_bk=16384):
    B, V = q.shape
    assert d.shape == (B, V), "fused scoring requires matched q/d shapes"

    cap = _vmem_capacity_bytes()
    bm = _pick_bm(B)
    bm = _shrink_bm_for_resident(bm, B, B, cap)
    itemsize = max(q.dtype.itemsize, d.dtype.itemsize)
    resident = bm * B * 4 + bm * 128 * 4 + bm * 4
    bk = _pick_bk(bm + B, itemsize, V, resident, max_bk)
    nk = _cdiv(V, bk)
    rem = V % bk
    last = nk - 1

    def kernel(q_ref, d_ref, cross_ref, pair_ref, pacc_ref):
        i = pl.program_id(0)
        k = pl.program_id(1)

        @pl.when(k == 0)
        def _():
            cross_ref[...] = jnp.zeros_like(cross_ref)
            pacc_ref[...] = jnp.zeros_like(pacc_ref)

        row0 = i * bm
        if bm % 8 == 0:
            row0 = pl.multiple_of(row0, 8)

        def accumulate(masked):
            qb = q_ref[...]          # (bm, bk)
            dall = d_ref[...]        # (B, bk) -- full d rows for this k slab
            if masked:
                valid = _lane_mask(bk, last * bk, V)
                qb = jnp.where(valid, qb, 0)
                dall = jnp.where(valid, dall, 0)
            cross_ref[...] += lax.dot_general(
                qb, dall,
                dimension_numbers=(((1,), (1,)), ((), ())),
                preferred_element_type=jnp.float32,
            )
            # Matched d rows for the paired score come from the already
            # VMEM-resident d block (no extra HBM traffic).
            d_pair = d_ref[pl.ds(row0, bm), :]
            _chunked_pair_accumulate(
                pacc_ref, qb, d_pair,
                bk=bk, rows=bm, masked=masked, last_col0=last * bk, V=V)

        if rem:
            @pl.when(k == last)
            def _():
                accumulate(True)

            if nk > 1:
                @pl.when(k < last)
                def _():
                    accumulate(False)
        else:
            accumulate(False)

        @pl.when(k == last)
        def _():
            pair_ref[...] = jnp.sum(pacc_ref[...], axis=-1, keepdims=True)

    cross, pair = pl.pallas_call(
        kernel,
        out_shape=(
            jax.ShapeDtypeStruct((B, B), jnp.float32),
            jax.ShapeDtypeStruct((B, 1), jnp.float32),
        ),
        grid_spec=pltpu.PrefetchScalarGridSpec(
            num_scalar_prefetch=0,
            grid=(B // bm, nk),
            in_specs=[
                pl.BlockSpec((bm, bk), lambda i, k: (i, k)),
                pl.BlockSpec((B, bk), lambda i, k: (0, k)),
            ],
            out_specs=[
                pl.BlockSpec((bm, B), lambda i, k: (i, 0)),
                pl.BlockSpec((bm, 1), lambda i, k: (i, 0)),
            ],
            scratch_shapes=[pltpu.VMEM((bm, 128), jnp.float32)],
        ),
        compiler_params=_compiler_params(("parallel", "arbitrary")),
    )(q, d)
    return cross, pair[:, 0]


# ---------------------------------------------------------------------------
# Faithful port of the abstract class.
# ---------------------------------------------------------------------------
class Loss(ABC):
    """The loss abstract class (JAX/Pallas port)."""

    def __init__(self, q_regularizer=None, d_regularizer=None) -> None:
        super().__init__()
        self.q_regularizer = q_regularizer
        self.d_regularizer = d_regularizer

    def forward(self, *args, **kwargs):
        # Exact semantics of the PyTorch base class: abstract, not implemented.
        # TODO(synk): concrete subclasses supply the actual loss; they call the
        # Pallas scoring kernels above plus their regularizers.
        raise NotImplementedError("the loss function is not yet implemented")

    __call__ = forward


if __name__ == "__main__":
    key = jax.random.PRNGKey(0)
    kq, kd, kq2, kd2, kd3 = jax.random.split(key, 5)

    # --- case 1: f32, V a multiple of the tile -----------------------------
    B, V = 8, 256
    q = jax.random.uniform(kq, (B, V), dtype=jnp.float32)
    d = jax.random.uniform(kd, (B, V), dtype=jnp.float32)

    # Abstract forward must raise, exactly like the PyTorch module.
    loss = Loss(q_regularizer=None, d_regularizer=None)
    try:
        loss(q, d)
        raise AssertionError("Loss.forward should have raised")
    except NotImplementedError:
        pass

    scores_cross = jax.block_until_ready(cross_dot_product(q, d))
    scores_pair = jax.block_until_ready(paired_dot_product(q, d))
    fused_cross, fused_pair = jax.block_until_ready(
        cross_and_paired_dot_product(q, d)
    )

    ref_cross = q @ d.T
    ref_pair = jnp.sum(q * d, axis=-1)
    assert jnp.allclose(scores_cross, ref_cross, atol=1e-3, rtol=1e-4)
    assert jnp.allclose(scores_pair, ref_pair, atol=1e-3, rtol=1e-4)
    assert jnp.allclose(fused_cross, ref_cross, atol=1e-3, rtol=1e-4)
    assert jnp.allclose(fused_pair, ref_pair, atol=1e-3, rtol=1e-4)

    # --- case 2: bf16, ragged V (masked last step only), Bq != Bd ----------
    Bq2, Bd2, V2 = 8, 16, 300
    q2 = jax.random.normal(kq2, (Bq2, V2), dtype=jnp.float32).astype(jnp.bfloat16)
    d2 = jax.random.normal(kd2, (Bd2, V2), dtype=jnp.float32).astype(jnp.bfloat16)
    d2p = jax.random.normal(kd3, (Bq2, V2), dtype=jnp.float32).astype(jnp.bfloat16)

    cross2 = jax.block_until_ready(cross_dot_product(q2, d2))
    pair2 = jax.block_until_ready(paired_dot_product(q2, d2p))
    fcross2, fpair2 = jax.block_until_ready(
        cross_and_paired_dot_product(q2, d2p)
    )

    ref_cross2 = q2.astype(jnp.float32) @ d2.astype(jnp.float32).T
    ref_pair2 = jnp.sum(q2.astype(jnp.float32) * d2p.astype(jnp.float32), axis=-1)
    ref_fcross2 = q2.astype(jnp.float32) @ d2p.astype(jnp.float32).T
    assert jnp.allclose(cross2, ref_cross2, atol=1e-2, rtol=1e-3)
    assert jnp.allclose(pair2, ref_pair2, atol=1e-2, rtol=1e-3)
    assert jnp.allclose(fcross2, ref_fcross2, atol=1e-2, rtol=1e-3)
    assert jnp.allclose(fpair2, ref_pair2, atol=1e-2, rtol=1e-3)

    print("KERNEL_OK")
</pallas_src>

<mosaic_0001>
module attributes {stable_mosaic.version = 11 : i64} {
  func.func @kernel(%arg0: i32, %arg1: i32, %arg2: memref<8x256xf32, #tpu.memory_space<vmem>>, %arg3: memref<8x256xf32, #tpu.memory_space<vmem>>, %arg4: memref<8x8xf32, #tpu.memory_space<vmem>>) attributes {dimension_semantics = [#tpu.dimension_semantics<parallel>, #tpu.dimension_semantics<arbitrary>], iteration_bounds = array<i64: 1, 1>, scalar_prefetch = 0 : i64, scratch_operands = 0 : i64, tpu.core_type = #tpu.core_type<tc>, window_params = [{transform_indices = @transform_0, window_bounds = array<i64: 8, 256>}, {transform_indices = @transform_1, window_bounds = array<i64: 8, 256>}, {transform_indices = @transform_2, window_bounds = array<i64: 8, 8>}]} {
    %c0_i32 = arith.constant 0 : i32
    %0 = arith.cmpi eq, %arg1, %c0_i32 : i32
    %1 = arith.extui %0 : i1 to i32
    %c0_i32_0 = arith.constant 0 : i32
    %2 = arith.cmpi ne, %1, %c0_i32_0 : i32
    scf.if %2 {
      %cst_8 = arith.constant 0.000000e+00 : f32
      %9 = vector.broadcast %cst_8 : f32 to vector<8x8xf32>
      %c0_9 = arith.constant 0 : index
      %c0_10 = arith.constant 0 : index
      %10 = vector.load %arg4[%c0_9, %c0_10] : memref<8x8xf32, #tpu.memory_space<vmem>>, vector<8x8xf32>
      tpu.vector_store %arg4[%c0_9, %c0_10], %9 {strides = array<i32>} : memref<8x8xf32, #tpu.memory_space<vmem>>, vector<8x8xf32>,
    } else {
    }
    %c0 = arith.constant 0 : index
    %c0_1 = arith.constant 0 : index
    %3 = vector.load %arg2[%c0, %c0_1] : memref<8x256xf32, #tpu.memory_space<vmem>>, vector<8x256xf32>
    %c0_2 = arith.constant 0 : index
    %c0_3 = arith.constant 0 : index
    %4 = vector.load %arg3[%c0_2, %c0_3] : memref<8x256xf32, #tpu.memory_space<vmem>>, vector<8x256xf32>
    %c0_4 = arith.constant 0 : index
    %c0_5 = arith.constant 0 : index
    %5 = vector.load %arg4[%c0_4, %c0_5] : memref<8x8xf32, #tpu.memory_space<vmem>>, vector<8x8xf32>
    %cst = arith.constant dense<0.000000e+00> : vector<8x8xf32>
    %6 = tpu.matmul %3, %4, %cst {dimension_numbers = #tpu.dot_dimension_numbers<[1], [1], [0], [0], [0, 0, 1, 0], [], []>} : vector<8x256xf32>, vector<8x256xf32>, vector<8x8xf32> -> vector<8x8xf32>
    %7 = arith.addf %5, %6 : vector<8x8xf32>
    %c0_6 = arith.constant 0 : index
    %c0_7 = arith.constant 0 : index
    %8 = vector.load %arg4[%c0_6, %c0_7] : memref<8x8xf32, #tpu.memory_space<vmem>>, vector<8x8xf32>
    tpu.vector_store %arg4[%c0_6, %c0_7], %7 {strides = array<i32>} : memref<8x8xf32, #tpu.memory_space<vmem>>, vector<8x8xf32>,
    return
  }
  func.func @transform_0(%arg0: i32, %arg1: i32) -> (i32, i32) {
    %c0_i32 = arith.constant 0 : i32
    return %arg0, %arg1 : i32, i32
  }
  func.func @transform_1(%arg0: i32, %arg1: i32) -> (i32, i32) {
    %c0_i32 = arith.constant 0 : i32
    %c0_i32_0 = arith.constant 0 : i32
    return %c0_i32, %arg1 : i32, i32
  }
  func.func @transform_2(%arg0: i32, %arg1: i32) -> (i32, i32) {
    %c0_i32 = arith.constant 0 : i32
    %c0_i32_0 = arith.constant 0 : i32
    return %arg0, %c0_i32 : i32, i32
  }
}

</mosaic_0001>

<bundles_post_ra>
// kernel: tpu_custom_call.1
= control target key start
LH: loop header
LB: loop body
LE: loop exit
PB: predicated region body
PF: predicated region fallthrough
CT: control target
= control target key end

     0   :  { %7 = vsyncpa [#allocation3], 0  ;;  %s236_s0 = inlined_call_operand.hbm [shape: f32[8,256], index: 0, kind: input, shape index: {}]   ;;  %s237_s1 = inlined_call_operand.hbm [shape: f32[8,256], index: 1, kind: input, shape index: {}]   ;;  %s238_s2 = inlined_call_operand.hbm [shape: f32[8,8], index: 2, kind: output, shape index: {}]  }
   0x1   :  { %8 = vsyncpa [#allocation6], 0 }
   0x2   :  { %9 = vsyncpa [#allocation4], 0  ;;  %s206_s9 = smov [#allocation2]   ;;  %s207_s11 = smov [#allocation5]  }
   0x3   :  { %s16_s10 = sshll.u32 %s206_s9, 4  ;;  %s26_s12 = sshll.u32 %s207_s11, 4  ;;  %s17_s10 = int_to_ptr.vmem [resolvable:$true] %s16_s10  ;;  %s27_s12 = int_to_ptr.vmem [resolvable:$true] %s26_s12 }
   0x4   :  { %s148_s13 = scalar_lea.vmem %s17_s10, 256  ;;  %p153_p1 = scmp.lt.s32.totalorder %s17_s10, %s17_s10 }
   0x5   :  { %p149_p0 = scmp.ne.s32.totalorder %s17_s10, %s148_s13  ;;  %p154_p2 = scmp.lt.s32.totalorder %s148_s13, %s148_s13 }
   0x7   :  { %p155_p3 = por %p154_p2, %p153_p1 }
   0x9   :  { %p156_p4 = pnand %p155_p3, %p149_p0 }
   0xb   :  { %159 = shalt.err (!%p156_p4)
}
   0xc   :  { %19 = dma.hbm_to_vmem [thread:$0]  %s236_s0, 256, %s17_s10, [#allocation3]  }
   0xd   :  { %s168_s16 = scalar_lea.vmem %s27_s12, 256  ;;  %p173_p6 = scmp.lt.s32.totalorder %s27_s12, %s27_s12 }
   0xe   :  { %p169_p5 = scmp.ne.s32.totalorder %s27_s12, %s168_s16  ;;  %p174_p7 = scmp.lt.s32.totalorder %s168_s16, %s168_s16 }
  0x10   :  { %p175_p8 = por %p174_p7, %p173_p6 }
  0x12   :  { %p176_p9 = pnand %p175_p8, %p169_p5 }
  0x14   :  { %179 = shalt.err (!%p176_p9)
}
  0x15   :  { %29 = dma.hbm_to_vmem [thread:$0]  %s237_s1, 256, %s27_s12, [#allocation6]  }
  0x16   :  { %200 = dma.done.wait [#allocation3], 256  }
  0x17   :  { %201 = vsyncadd [#allocation3], 4294967040 }
  0x18   :  { %202 = dma.done.wait [#allocation6], 256  }
  0x19   :  { %203 = vsyncadd [#allocation6], 4294967040  ;;  %vm40_vm0 = vcmask 64512   ;;  %v208_v0 = vmov 0.0   ;;  %v45_v1 = vld [vmem:[#allocation5 + $0x8] sm:$0xff]  ;;  %v44_v2 = vld [vmem:[#allocation5] sm:$0xff] }
  0x1a   :  { %41 = vst.msk [vmem:[#allocation7] sm:$0xff] %vm40_vm0, %v208_v0  ;;  %v43_v3 = vld [vmem:[#allocation2 + $0x8] sm:$0xff]  ;;  %77 = vmatprep.subr.mxu0 %v45_v1  ;;  %v42_v4 = vld [vmem:[#allocation2] sm:$0xff]  ;;  %s209_s0 = smov [#allocation7]  }
  0x1b   :  { %111 = vmatprep.mubr.f32.mxu0 %v43_v3  ;;  %78 = vmatpush1.xpose.msra.mxu0 %v44_v2  ;;  %s126_s19 = sshll.u32 %s209_s0, 4  ;;  %s127_s19 = int_to_ptr.vmem [resolvable:$true] %s126_s19 }
  0x1c   :  { %s180_s1 = scalar_lea.vmem %s127_s19, 128  ;;  %p185_p11 = scmp.lt.s32.totalorder %s127_s19, %s127_s19 }
  0x1d   :  { %p181_p10 = scmp.ne.s32.totalorder %s127_s19, %s180_s1  ;;  %p186_p12 = scmp.lt.s32.totalorder %s180_s1, %s180_s1 }
  0x1e   :  { %112 = vmatmul.mubr.f32.vlgmr.msra.gmra.mxu0 %v42_v4 }
  0x1f   :  { %p187_p13 = por %p186_p12, %p185_p11 }
  0x21   :  { %v46_v5 = vld [vmem:[#allocation7] sm:$0xff]  ;;  %p188_p0 = pnand %p187_p13, %p181_p10 }
  0xde   :  { %v113_v6 = vpop.f32.mrf.mxu0 }
  0xdf   :  { %v117_v7 = vadd.f32 %v113_v6, %v46_v5 }
  0xe0   :  { %v115_v8 = vpop.f32.mrf.mxu0 }
  0xe1   :  { %119 = vst.msk [vmem:[#allocation7] sm:$0xff] %vm40_vm0, %v117_v7 }
  0xe2   :  { %191 = shalt.err (!%p188_p0)
}
  0xe3   :  { %129 = dma.vmem_to_hbm [thread:$0]  %s127_s19, 128, %s238_s2, [#allocation4]  }
  0xe4   :  { %204 = dma.done.wait [#allocation4], 128  }
  0xe5   :  { %205 = vsyncadd [#allocation4], 4294967168 }
  0xe6   :  { %133 = vsyncpa [#allocation3], 1 }
  0xe7   :  { %134 = vsyncpa [#allocation6], 1 }
  0xe8   :  { %135 = vsyncpa [#allocation4], 1 }

</bundles_post_ra>
